<compile_context>
chip_gen: v5e
topology: v5e:2x2
jax: 0.10.0
libtpu: 0.0.40
codegen_flags: <defaults>
</compile_context>

<pallas_src>
import jax
import jax.numpy as jnp
import numpy as np
from jax.experimental import pallas as pl
from jax.experimental.pallas import tpu as pltpu


def _make_kernel(filter_size: int, max_pool_size: int, pooled_len: int):
    F, P = filter_size, max_pool_size
    n_taps = P + F - 1  # distinct x-offsets t = p + k needed by fused conv+pool

    def kernel(y_ref, cw_ref, cb_ref, hw_ref, hb_ref, o_ref):
        # y_ref : (P, TB, Lp)          VMEM, y[m, b, j] = x[b, j*P + m]
        # cw_ref: (F,)                 SMEM  conv weight taps (scalars)
        # cb_ref: (1,)                 SMEM  conv bias (scalar)
        # hw_ref: (pooled_len, fc_out) VMEM  head weight (transposed)
        # hb_ref: (1, fc_out)          VMEM  head bias
        # o_ref : (TB, fc_out)         VMEM
        cw = [cw_ref[k] for k in range(F)]  # hoisted: each scalar tap read once
        cb = cb_ref[0]

        # z[t][b, j] = x[b, j*P + t] -- contiguous lane-dense loads from y.
        z = [y_ref[t % P, :, pl.ds(t // P, pooled_len)] for t in range(n_taps)]

        pooled = None
        for p in range(P):  # fused Conv1d + bias + ReLU + MaxPool1d (VPU)
            acc = z[p] * cw[0]
            for k in range(1, F):
                acc = acc + z[p + k] * cw[k]
            conv_p = jnp.maximum(acc + cb, 0.0)
            pooled = conv_p if pooled is None else jnp.maximum(pooled, conv_p)
        # The module's second ReLU is a no-op on already non-negative values.

        out = jnp.dot(pooled, hw_ref[...], preferred_element_type=jnp.float32)
        o_ref[...] = out + hb_ref[...]

    return kernel


def simple_arch_with_pooling(x, conv_w, conv_b, head_w, head_b,
                             filter_size: int, max_pool_size: int,
                             batch_tile=None):
    F, P = int(filter_size), int(max_pool_size)
    B = x.shape[0]
    L_in = x.shape[-1]
    L_conv = L_in - F + 1
    pooled_len = L_conv // P                       # floor, like torch MaxPool1d
    fc_out = head_w.shape[0]
    assert pooled_len >= 1

    # ---- wrapper glue (plain JAX, no data amplification) -------------------
    x2 = x[:, 0, :].astype(jnp.float32)            # (B, L_in)

    max_shift = (P + F - 2) // P                   # largest in-kernel lane offset
    Lp = pooled_len + max_shift
    L_pad = Lp * P
    if L_pad > L_in:
        x2 = jnp.pad(x2, ((0, 0), (0, L_pad - L_in)))   # padded tail never read
    else:
        x2 = x2[:, :L_pad]
    # polyphase: y[m, b, j] = x[b, j*P + m]
    y = jnp.transpose(x2.reshape(B, Lp, P), (2, 0, 1))  # (P, B, Lp)

    cw = conv_w.reshape(F).astype(jnp.float32)            # (F,)
    cb = conv_b.reshape(1).astype(jnp.float32)            # (1,)
    hw_t = jnp.asarray(head_w).T.astype(jnp.float32)      # (pooled_len, fc_out)
    hb = head_b.reshape(1, fc_out).astype(jnp.float32)    # (1, fc_out)

    # ---- batch tiling (parallel grid axis) ----------------------------------
    if batch_tile is None:
        batch_tile = next((t for t in (32, 16, 8) if B % t == 0), B)
    assert B % batch_tile == 0
    grid = (B // batch_tile,)

    kernel = _make_kernel(F, P, pooled_len)
    flops = 2 * B * pooled_len * (P * F + fc_out)
    bytes_accessed = 4 * (B * L_pad + F + 1 + pooled_len * fc_out
                          + fc_out + B * fc_out)

    return pl.pallas_call(
        kernel,
        out_shape=jax.ShapeDtypeStruct((B, fc_out), jnp.float32),
        grid=grid,
        in_specs=[
            pl.BlockSpec((P, batch_tile, Lp), lambda i: (0, i, 0)),   # x polyphase
            pl.BlockSpec(memory_space=pltpu.MemorySpace.SMEM),        # conv taps
            pl.BlockSpec(memory_space=pltpu.MemorySpace.SMEM),        # conv bias
            pl.BlockSpec((pooled_len, fc_out), lambda i: (0, 0)),     # head W^T
            pl.BlockSpec((1, fc_out), lambda i: (0, 0)),              # head bias
        ],
        out_specs=pl.BlockSpec((batch_tile, fc_out), lambda i: (i, 0)),
        compiler_params=pltpu.CompilerParams(
            dimension_semantics=("parallel",),       # megacore sharding on v7x
            vmem_limit_bytes=32 * 1024 * 1024,       # explicit (v5e default 16 MiB)
        ),
        cost_estimate=pl.CostEstimate(flops=flops, transcendentals=0,
                                      bytes_accessed=bytes_accessed),
    )(y, cw, cb, hw_t, hb)


if __name__ == "__main__":
    # Small shapes consistent with the module: x is (B, 1, input_size).
    # input_size=516, F=5, P=4 -> pooled_len = 128 (lane-dense last dim).
    B, input_size, filter_size, max_pool_size, fc_out = 64, 516, 5, 4, 4
    L_conv = input_size - filter_size + 1
    pooled_len = L_conv // max_pool_size            # == Linear in_features

    key = jax.random.PRNGKey(0)
    k1, k2, k3, k4, k5 = jax.random.split(key, 5)
    x = jax.random.normal(k1, (B, 1, input_size), jnp.float32)

    # Deterministic parameter init mimicking PyTorch default uniform bounds
    bound_c = 1.0 / np.sqrt(1 * filter_size)
    conv_w = jax.random.uniform(k2, (1, 1, filter_size), jnp.float32, -bound_c, bound_c)
    conv_b = jax.random.uniform(k3, (1,), jnp.float32, -bound_c, bound_c)
    bound_h = 1.0 / np.sqrt(pooled_len)
    head_w = jax.random.uniform(k4, (fc_out, pooled_len), jnp.float32, -bound_h, bound_h)
    head_b = jax.random.uniform(k5, (fc_out,), jnp.float32, -bound_h, bound_h)

    out = simple_arch_with_pooling(x, conv_w, conv_b, head_w, head_b,
                                   filter_size, max_pool_size)
    out = jax.block_until_ready(out)

    # Pure-JAX reference of the PyTorch forward
    x2 = x[:, 0, :]
    conv = sum(conv_w[0, 0, k] * x2[:, k:k + L_conv] for k in range(filter_size)) + conv_b[0]
    conv = jnp.maximum(conv, 0.0)
    pooled = conv[:, :pooled_len * max_pool_size].reshape(B, pooled_len, max_pool_size).max(-1)
    pooled = jnp.maximum(pooled, 0.0)
    ref = pooled @ head_w.T + head_b

    assert np.allclose(np.asarray(out), np.asarray(ref), rtol=1e-5, atol=1e-5), \
        "Pallas kernel output mismatch vs reference"
    print("KERNEL_OK")
</pallas_src>

<mosaic_0001>
module attributes {stable_mosaic.version = 11 : i64} {
  func.func @kernel(%arg0: i32, %arg1: memref<4x32x129xf32, #tpu.memory_space<vmem>>, %arg2: memref<5xf32, #tpu.memory_space<smem>>, %arg3: memref<1xf32, #tpu.memory_space<smem>>, %arg4: memref<128x4xf32, #tpu.memory_space<vmem>>, %arg5: memref<1x4xf32, #tpu.memory_space<vmem>>, %arg6: memref<32x4xf32, #tpu.memory_space<vmem>>) attributes {dimension_semantics = [#tpu.dimension_semantics<parallel>], iteration_bounds = array<i64: 2>, scalar_prefetch = 0 : i64, scratch_operands = 0 : i64, tpu.core_type = #tpu.core_type<tc>, window_params = [{transform_indices = @transform_0, window_bounds = array<i64: 4, 32, 129>}, {transform_indices = @transform_1, window_bounds = array<i64: 5>}, {transform_indices = @transform_2, window_bounds = array<i64: 1>}, {pipeline_mode = #tpu.pipeline_mode<synchronous>, transform_indices = @transform_3, window_bounds = array<i64: 128, 4>}, {pipeline_mode = #tpu.pipeline_mode<synchronous>, transform_indices = @transform_4, window_bounds = array<i64: 1, 4>}, {transform_indices = @transform_5, window_bounds = array<i64: 32, 4>}]} {
    %c0 = arith.constant 0 : index
    %0 = memref.load %arg2[%c0] : memref<5xf32, #tpu.memory_space<smem>>
    %c1 = arith.constant 1 : index
    %1 = memref.load %arg2[%c1] : memref<5xf32, #tpu.memory_space<smem>>
    %c2 = arith.constant 2 : index
    %2 = memref.load %arg2[%c2] : memref<5xf32, #tpu.memory_space<smem>>
    %c3 = arith.constant 3 : index
    %3 = memref.load %arg2[%c3] : memref<5xf32, #tpu.memory_space<smem>>
    %c4 = arith.constant 4 : index
    %4 = memref.load %arg2[%c4] : memref<5xf32, #tpu.memory_space<smem>>
    %c0_0 = arith.constant 0 : index
    %5 = memref.load %arg3[%c0_0] : memref<1xf32, #tpu.memory_space<smem>>
    %c0_1 = arith.constant 0 : index
    %c0_2 = arith.constant 0 : index
    %c0_3 = arith.constant 0 : index
    %6 = vector.load %arg1[%c0_1, %c0_2, %c0_3] : memref<4x32x129xf32, #tpu.memory_space<vmem>>, vector<1x32x128xf32>
    %7 = vector.shape_cast %6 : vector<1x32x128xf32> to vector<32x128xf32>
    %c1_4 = arith.constant 1 : index
    %c0_5 = arith.constant 0 : index
    %c0_6 = arith.constant 0 : index
    %8 = vector.load %arg1[%c1_4, %c0_5, %c0_6] : memref<4x32x129xf32, #tpu.memory_space<vmem>>, vector<1x32x128xf32>
    %9 = vector.shape_cast %8 : vector<1x32x128xf32> to vector<32x128xf32>
    %c2_7 = arith.constant 2 : index
    %c0_8 = arith.constant 0 : index
    %c0_9 = arith.constant 0 : index
    %10 = vector.load %arg1[%c2_7, %c0_8, %c0_9] : memref<4x32x129xf32, #tpu.memory_space<vmem>>, vector<1x32x128xf32>
    %11 = vector.shape_cast %10 : vector<1x32x128xf32> to vector<32x128xf32>
    %c3_10 = arith.constant 3 : index
    %c0_11 = arith.constant 0 : index
    %c0_12 = arith.constant 0 : index
    %12 = vector.load %arg1[%c3_10, %c0_11, %c0_12] : memref<4x32x129xf32, #tpu.memory_space<vmem>>, vector<1x32x128xf32>
    %13 = vector.shape_cast %12 : vector<1x32x128xf32> to vector<32x128xf32>
    %c0_13 = arith.constant 0 : index
    %c0_14 = arith.constant 0 : index
    %c1_15 = arith.constant 1 : index
    %14 = vector.load %arg1[%c0_13, %c0_14, %c1_15] : memref<4x32x129xf32, #tpu.memory_space<vmem>>, vector<1x32x128xf32>
    %15 = vector.shape_cast %14 : vector<1x32x128xf32> to vector<32x128xf32>
    %c1_16 = arith.constant 1 : index
    %c0_17 = arith.constant 0 : index
    %c1_18 = arith.constant 1 : index
    %16 = vector.load %arg1[%c1_16, %c0_17, %c1_18] : memref<4x32x129xf32, #tpu.memory_space<vmem>>, vector<1x32x128xf32>
    %17 = vector.shape_cast %16 : vector<1x32x128xf32> to vector<32x128xf32>
    %c2_19 = arith.constant 2 : index
    %c0_20 = arith.constant 0 : index
    %c1_21 = arith.constant 1 : index
    %18 = vector.load %arg1[%c2_19, %c0_20, %c1_21] : memref<4x32x129xf32, #tpu.memory_space<vmem>>, vector<1x32x128xf32>
    %19 = vector.shape_cast %18 : vector<1x32x128xf32> to vector<32x128xf32>
    %c3_22 = arith.constant 3 : index
    %c0_23 = arith.constant 0 : index
    %c1_24 = arith.constant 1 : index
    %20 = vector.load %arg1[%c3_22, %c0_23, %c1_24] : memref<4x32x129xf32, #tpu.memory_space<vmem>>, vector<1x32x128xf32>
    %21 = vector.shape_cast %20 : vector<1x32x128xf32> to vector<32x128xf32>
    %22 = vector.broadcast %0 : f32 to vector<32x128xf32>
    %23 = arith.mulf %7, %22 : vector<32x128xf32>
    %24 = vector.broadcast %1 : f32 to vector<32x128xf32>
    %25 = arith.mulf %9, %24 : vector<32x128xf32>
    %26 = arith.addf %23, %25 : vector<32x128xf32>
    %27 = vector.broadcast %2 : f32 to vector<32x128xf32>
    %28 = arith.mulf %11, %27 : vector<32x128xf32>
    %29 = arith.addf %26, %28 : vector<32x128xf32>
    %30 = vector.broadcast %3 : f32 to vector<32x128xf32>
    %31 = arith.mulf %13, %30 : vector<32x128xf32>
    %32 = arith.addf %29, %31 : vector<32x128xf32>
    %33 = vector.broadcast %4 : f32 to vector<32x128xf32>
    %34 = arith.mulf %15, %33 : vector<32x128xf32>
    %35 = arith.addf %32, %34 : vector<32x128xf32>
    %36 = vector.broadcast %5 : f32 to vector<32x128xf32>
    %37 = arith.addf %35, %36 : vector<32x128xf32>
    %cst = arith.constant 0.000000e+00 : f32
    %38 = vector.broadcast %cst : f32 to vector<32x128xf32>
    %39 = arith.maximumf %37, %38 : vector<32x128xf32>
    %40 = vector.broadcast %0 : f32 to vector<32x128xf32>
    %41 = arith.mulf %9, %40 : vector<32x128xf32>
    %42 = vector.broadcast %1 : f32 to vector<32x128xf32>
    %43 = arith.mulf %11, %42 : vector<32x128xf32>
    %44 = arith.addf %41, %43 : vector<32x128xf32>
    %45 = vector.broadcast %2 : f32 to vector<32x128xf32>
    %46 = arith.mulf %13, %45 : vector<32x128xf32>
    %47 = arith.addf %44, %46 : vector<32x128xf32>
    %48 = vector.broadcast %3 : f32 to vector<32x128xf32>
    %49 = arith.mulf %15, %48 : vector<32x128xf32>
    %50 = arith.addf %47, %49 : vector<32x128xf32>
    %51 = vector.broadcast %4 : f32 to vector<32x128xf32>
    %52 = arith.mulf %17, %51 : vector<32x128xf32>
    %53 = arith.addf %50, %52 : vector<32x128xf32>
    %54 = vector.broadcast %5 : f32 to vector<32x128xf32>
    %55 = arith.addf %53, %54 : vector<32x128xf32>
    %cst_25 = arith.constant 0.000000e+00 : f32
    %56 = vector.broadcast %cst_25 : f32 to vector<32x128xf32>
    %57 = arith.maximumf %55, %56 : vector<32x128xf32>
    %58 = arith.maximumf %39, %57 : vector<32x128xf32>
    %59 = vector.broadcast %0 : f32 to vector<32x128xf32>
    %60 = arith.mulf %11, %59 : vector<32x128xf32>
    %61 = vector.broadcast %1 : f32 to vector<32x128xf32>
    %62 = arith.mulf %13, %61 : vector<32x128xf32>
    %63 = arith.addf %60, %62 : vector<32x128xf32>
    %64 = vector.broadcast %2 : f32 to vector<32x128xf32>
    %65 = arith.mulf %15, %64 : vector<32x128xf32>
    %66 = arith.addf %63, %65 : vector<32x128xf32>
    %67 = vector.broadcast %3 : f32 to vector<32x128xf32>
    %68 = arith.mulf %17, %67 : vector<32x128xf32>
    %69 = arith.addf %66, %68 : vector<32x128xf32>
    %70 = vector.broadcast %4 : f32 to vector<32x128xf32>
    %71 = arith.mulf %19, %70 : vector<32x128xf32>
    %72 = arith.addf %69, %71 : vector<32x128xf32>
    %73 = vector.broadcast %5 : f32 to vector<32x128xf32>
    %74 = arith.addf %72, %73 : vector<32x128xf32>
    %cst_26 = arith.constant 0.000000e+00 : f32
    %75 = vector.broadcast %cst_26 : f32 to vector<32x128xf32>
    %76 = arith.maximumf %74, %75 : vector<32x128xf32>
    %77 = arith.maximumf %58, %76 : vector<32x128xf32>
    %78 = vector.broadcast %0 : f32 to vector<32x128xf32>
    %79 = arith.mulf %13, %78 : vector<32x128xf32>
    %80 = vector.broadcast %1 : f32 to vector<32x128xf32>
    %81 = arith.mulf %15, %80 : vector<32x128xf32>
    %82 = arith.addf %79, %81 : vector<32x128xf32>
    %83 = vector.broadcast %2 : f32 to vector<32x128xf32>
    %84 = arith.mulf %17, %83 : vector<32x128xf32>
    %85 = arith.addf %82, %84 : vector<32x128xf32>
    %86 = vector.broadcast %3 : f32 to vector<32x128xf32>
    %87 = arith.mulf %19, %86 : vector<32x128xf32>
    %88 = arith.addf %85, %87 : vector<32x128xf32>
    %89 = vector.broadcast %4 : f32 to vector<32x128xf32>
    %90 = arith.mulf %21, %89 : vector<32x128xf32>
    %91 = arith.addf %88, %90 : vector<32x128xf32>
    %92 = vector.broadcast %5 : f32 to vector<32x128xf32>
    %93 = arith.addf %91, %92 : vector<32x128xf32>
    %cst_27 = arith.constant 0.000000e+00 : f32
    %94 = vector.broadcast %cst_27 : f32 to vector<32x128xf32>
    %95 = arith.maximumf %93, %94 : vector<32x128xf32>
    %96 = arith.maximumf %77, %95 : vector<32x128xf32>
    %c0_28 = arith.constant 0 : index
    %c0_29 = arith.constant 0 : index
    %97 = vector.load %arg4[%c0_28, %c0_29] : memref<128x4xf32, #tpu.memory_space<vmem>>, vector<128x4xf32>
    %cst_30 = arith.constant dense<0.000000e+00> : vector<32x4xf32>
    %98 = tpu.matmul %96, %97, %cst_30 {dimension_numbers = #tpu.dot_dimension_numbers<[1], [0], [0], [1], [0, 0, 1, 1], [], []>} : vector<32x128xf32>, vector<128x4xf32>, vector<32x4xf32> -> vector<32x4xf32>
    %c0_31 = arith.constant 0 : index
    %c0_32 = arith.constant 0 : index
    %99 = vector.load %arg5[%c0_31, %c0_32] : memref<1x4xf32, #tpu.memory_space<vmem>>, vector<1x4xf32>
    %100 = vector.broadcast %99 : vector<1x4xf32> to vector<32x4xf32>
    %101 = arith.addf %98, %100 : vector<32x4xf32>
    %c0_33 = arith.constant 0 : index
    %c0_34 = arith.constant 0 : index
    %102 = vector.load %arg6[%c0_33, %c0_34] : memref<32x4xf32, #tpu.memory_space<vmem>>, vector<32x4xf32>
    tpu.vector_store %arg6[%c0_33, %c0_34], %101 {strides = array<i32>} : memref<32x4xf32, #tpu.memory_space<vmem>>, vector<32x4xf32>,
    return
  }
  func.func @transform_0(%arg0: i32) -> (i32, i32, i32) {
    %c0_i32 = arith.constant 0 : i32
    %c0_i32_0 = arith.constant 0 : i32
    %c0_i32_1 = arith.constant 0 : i32
    return %c0_i32, %arg0, %c0_i32_0 : i32, i32, i32
  }
  func.func @transform_1(%arg0: i32) -> i32 {
    %c0_i32 = arith.constant 0 : i32
    %c0_i32_0 = arith.constant 0 : i32
    return %c0_i32 : i32
  }
  func.func @transform_2(%arg0: i32) -> i32 {
    %c0_i32 = arith.constant 0 : i32
    %c0_i32_0 = arith.constant 0 : i32
    return %c0_i32 : i32
  }
  func.func @transform_3(%arg0: i32) -> (i32, i32) {
    %c0_i32 = arith.constant 0 : i32
    %c0_i32_0 = arith.constant 0 : i32
    %c0_i32_1 = arith.constant 0 : i32
    return %c0_i32, %c0_i32_0 : i32, i32
  }
  func.func @transform_4(%arg0: i32) -> (i32, i32) {
    %c0_i32 = arith.constant 0 : i32
    %c0_i32_0 = arith.constant 0 : i32
    %c0_i32_1 = arith.constant 0 : i32
    return %c0_i32, %c0_i32_0 : i32, i32
  }
  func.func @transform_5(%arg0: i32) -> (i32, i32) {
    %c0_i32 = arith.constant 0 : i32
    %c0_i32_0 = arith.constant 0 : i32
    return %arg0, %c0_i32 : i32, i32
  }
}

</mosaic_0001>

<bundles_post_ra>
// kernel: tpu_custom_call.1
= control target key start
LH: loop header
LB: loop body
LE: loop exit
PB: predicated region body
PF: predicated region fallthrough
CT: control target
= control target key end

     0   :  { %s1956_s0 = inlined_call_operand.hbm [shape: f32[4,64,129], index: 0, kind: input, shape index: {}]   ;;  %s1957_s1 = inlined_call_operand.vmem [shape: f32[5], index: 1, kind: input, shape index: {}]   ;;  %s1958_s2 = inlined_call_operand.<no memory space> [shape: f32[1], index: 2, kind: input, shape index: {}]   ;;  %s1959_s3 = inlined_call_operand.vmem [shape: f32[128,4], index: 3, kind: input, shape index: {}]   ;;  %s1960_s4 = inlined_call_operand.vmem [shape: f32[1,4], index: 4, kind: input, shape index: {}]   ;;  %s1961_s5 = inlined_call_operand.vmem [shape: f32[64,4], index: 5, kind: output, shape index: {}]  }
   0x1   :  { %10 = sst [smem:[#allocation2]] %s1958_s2 }
   0x2   :  { %11 = vsyncpa [#allocation4], 0 }
   0x3   :  { %13 = vsyncpa [#allocation4 + $0x1], 0 }
   0x4   :  { %14 = vsyncpa [#allocation5], 0  ;;  %s1271_s20 = smov 0   ;;  %s1273_s21 = smov 0  }
   0x5   :  { %s1275_s22 = smov 0   ;;  %s1277_s23 = smov 0  }
   0x6 LB: > { %s1019_s2 = sadd.s32 4294967295, %s1228_s23   ;;  %s1291_s24 = sadd.s32 1, %s1228_s23   ;;  %s1228_s23 = sphi %s1277_s23, %s1969_s23   ;;  %s1224_s22 = sphi %s1275_s22, %s1968_s22   ;;  %s1220_s21 = sphi %s1273_s21, %s1967_s21   ;;  %s1216_s20 = sphi %s1271_s20, %s1966_s20  }
   0x7   : > { %s24_s25 = ssub.s32 %s1228_s23, %s1291_s24  ;;  %s27_s26 = sadd.s32 1, %s1224_s22 }
   0x8   : > { %p25_p0 = scmp.eq.s32.totalorder %s24_s25, 0  ;;  %p34_p1 = scmp.ne.s32.totalorder %s1224_s22, %s1220_s21 }
   0x9   : > { %p35_p2 = scmp.eq.s32.totalorder %s1228_s23, 0  ;;  %p40_p3 = scmp.ne.s32.totalorder %s1220_s21, %s1216_s20 }
   0xa   : > { %s1301_s27 = scalar_select %p25_p0, %s1224_s22, %s27_s26  }
   0xb   : > { %p1303_p4 = por %p35_p2, %p34_p1  ;;  %p1309_p5 = scmp.eq.s32.totalorder %s1019_s2, 0 }
   0xc   : > { %p1021_p6 = scmp.ge.s32.totalorder %s1228_s23, 1  ;;  %p161_p7 = scmp.lt.s32.totalorder %s1228_s23, 3 }
   0xd   : > { %p1317_p8 = por %p1309_p5, %p40_p3  ;;  %s173_s9 = sshll.u32 %s1957_s1, 4  ;;  %s174_s9 = int_to_ptr.vmem [resolvable:$true] %s173_s9 }
   0xe   : > { %p1321_p9 = pnand %p1021_p6, %p161_p7  ;;  %s1230_s10 = smov [#allocation6]  }
   0xf   : > { %p1023_p12 = scmp.ge.s32.totalorder %s1228_s23, 2 }
  0x10   : > { %p1128_p10 = pneg %p1321_p9 }
  0x11   : > { %189 = sbr.rel (%p1023_p12) target bundleno = 36 (0x24), region = 32 }
  0x12   : > { %p1129_p11 = pnand %p1128_p10, %p1309_p5 }
  0x14   : > { %1131 = dma.vmem_to_smem (!%p1129_p11), %s174_s9, 16, %s1230_s10, [#allocation5]  }
  0x16   : > { %s193_s11 = sand.u32 1, %s1224_s22   ;;  %s1066_s12 = sshll.u32 %s1228_s23, 6 }
  0x17   : > { %s1024_s13 = sshll.u32 %s193_s11, 8  ;;  %s203_s16 = scalar_lea.hbm %s1956_s0, %s1066_s12 }
  0x18   : > { %s1117_s17 = scalar_select %p1303_p4, [#allocation0], [#allocation9] }
  0x19   : > { %s216_s18 = sshll.u32 %s203_s16, 4  ;;  %s197_s19 = scalar_lea.vmem [#allocation3], %s1024_s13  ;;  %s217_s18 = int_to_ptr.hbm [resolvable:$true] %s216_s18 }
  0x1a   : > { %s218_s20 = sshll.u32 %s197_s19, 4  ;;  %s208_s25 = sld [smem:[%s1117_s17]]   ;;  %s219_s20 = int_to_ptr.vmem [resolvable:$true] %s218_s20 }
  0x1b   : > { %s1231_s26 = smov 2048   ;;  %s1232_s7 = smov 1024  }
  0x1c   : > { %1118 = sst [smem:[#allocation8]] (%p1303_p4), %s1231_s26  ;;  %s1233_s8 = smov 4  }
  0x1d   : > { %1119 = sst [smem:[#allocation8 + $0x1]] (%p1303_p4), %s1232_s7  ;;  %s1234_s9 = smov 256  }
  0x1e   : > { %1120 = sst [smem:[#allocation8 + $0x2]] (%p1303_p4), %s1233_s8  ;;  %s1235_s13 = smov 16  }
  0x1f   : > { %1121 = sst [smem:[#allocation8 + $0x3]] (%p1303_p4), %s1234_s9  ;;  %s194_s14 = scalar_lea.sflag [#allocation4], %s193_s11 }
  0x20   : > { %s1028_s10 = sshll.u32 %s208_s25, 26  ;;  %1122 = sst [smem:[#allocation8 + $0x4]] (%p1303_p4), %s1234_s9 }
  0x21   : > { %s1029_s12 = sadd.s32 134217728, %s1028_s10  ;;  %1123 = sst [smem:[#allocation8 + $0x5]] (%p1303_p4), %s1235_s13 }
  0x22   : > { %s1236_s15 = smov [#allocation7]  }
  0x23   : > { %1124 = dma.general (%p1303_p4), %s217_s18, 4096, %s219_s20, %s194_s14, %s1236_s15, [#allocation8], %s1029_s12, 0  }
  0x24 PF: > { %243 = sbr.rel (%p1321_p9) target bundleno = 517 (0x205), region = 40  ;;  %s245_s16 = sand.u32 (!%p1321_p9), 1, %s1220_s21  }
  0x25   : > { %s1031_s17 = sshll.u32 (!%p1321_p9), %s245_s16, 8  ;;  %s246_s19 = scalar_lea.sflag (!%p1321_p9), [#allocation4], %s245_s16 }
  0x26   : > { %s1357_s25 = scalar_lea.vmem (!%p1321_p9), [#allocation3], %s1031_s17 }
  0x29   : > { %1207 = dma.done.wait (%p1317_p8), %s246_s19, 4096  }
  0x2a   : > { %1209 = vsyncadd (%p1317_p8), %s246_s19, 4294963200 }
  0x2b   : > { %1211 = dma.done.wait (%p1309_p5), [#allocation5], 16  }
  0x2c   : > { %1213 = vsyncadd (%p1309_p5), [#allocation5], 4294967280 }
  0x2d   : > { %260 = sfence }
  0x2e   : > { %s1038_s28 = sld [smem:[#allocation6 + $0x4]]  ;;  %v1368_v0 = vld [vmem:[%s1357_s25 + $0x20] sm:$0xff]  ;;  %v1371_v1 = vld [vmem:[%s1357_s25 + $0x10] sm:$0xff]  ;;  %s1237_s29 = smov 127   ;;  %v317_v7 = vld [vmem:[%s1357_s25 + $0x28] sm:$0xff]  ;;  %vm396_vm0 = vcmask 1039360  }
  0x2f   : > { %v1374_v2 = vld [vmem:[%s1357_s25] sm:$0xff]  ;;  %v1389_v8 = vld [vmem:[%s1357_s25 + $0x18] sm:$0xff]  ;;  %s1037_s30 = sld [smem:[#allocation6 + $0x3]]  ;;  %v1392_v9 = vld [vmem:[%s1357_s25 + $0x8] sm:$0xff]  ;;  %vm935_vm1 = vcmask 31744  }
  0x30   : > { %v318_v13 = vld [vmem:[%s1357_s25 + $0x38] sm:$0xff]  ;;  %v1406_v15 = vld [vmem:[%s1357_s25 + $0x30] sm:$0xff]  ;;  %s1036_s6 = sld [smem:[#allocation6 + $0x2]]  ;;  %v1434_v25 = vld [vmem:[%s1357_s25 + $0x40] sm:$0xff] }
  0x31   : > { %s1035_s11 = sld [smem:[#allocation6 + $0x1]]  ;;  %v1053_v37 = vld [vmem:[%s1357_s25 + $0x68] sm:$0xff]  ;;  %v1465_v38 = vld [vmem:[%s1357_s25 + $0x60] sm:$0xff]  ;;  %v1054_v45 = vld [vmem:[%s1357_s25 + $0x78] sm:$0xff] }
  0x32   : > { %v1484_v46 = vld [vmem:[%s1357_s25 + $0x70] sm:$0xff]  ;;  %s290_s18 = sld [smem:[#allocation6]]  ;;  %v1505_v56 = vld [vmem:[%s1357_s25 + $0xa0] sm:$0xff] }
  0x33   : > { %v1513_v59 = vld [vmem:[%s1357_s25 + $0xe0] sm:$0xff]  ;;  %s295_s20 = sld [smem:[#allocation2]] }
  0x34   : > { %v1376_v3 = vstv %s1038_s28 }
  0x35   : > { %v368_v4 = vmul.f32 %v1376_v3, %v1368_v0  ;;  %v366_v5 = vmul.f32 %v1376_v3, %v1371_v1  ;;  %v364_v6 = vmul.f32 %v1376_v3, %v1374_v2  ;;  %v369_v10 = vmul.f32 %v1376_v3, %v317_v7 }
  0x36   : > { %v367_v11 = vmul.f32 %v1376_v3, %v1389_v8  ;;  %v365_v12 = vmul.f32 %v1376_v3, %v1392_v9  ;;  %v1403_v14 = vstv %s1037_s30  ;;  %v371_v16 = vmul.f32 %v1376_v3, %v318_v13 }
  0x37   : > { %388 = vrot.lane.b32.xlu2 %v368_v4, %s1237_s29  ;;  %384 = vrot.lane.b32.xlu1 %v366_v5, %s1237_s29  ;;  %v438_v17 = vmul.f32 %v1403_v14, %v1374_v2  ;;  %v370_v18 = vmul.f32 %v1376_v3, %v1406_v15  ;;  %v440_v19 = vmul.f32 %v1403_v14, %v1371_v1  ;;  %v1436_v26 = vstv %s1036_s6 }
  0x38   : > { %380 = vrot.lane.b32.xlu0 %v364_v6, %s1237_s29  ;;  %v441_v20 = vmul.f32 %v1403_v14, %v1389_v8  ;;  %v439_v21 = vmul.f32 %v1403_v14, %v1392_v9  ;;  %v443_v22 = vmul.f32 %v1403_v14, %v317_v7  ;;  %v444_v23 = vmul.f32 %v1403_v14, %v1406_v15 }
  0x39   : > { %v442_v24 = vmul.f32 %v1403_v14, %v1368_v0  ;;  %v482_v27 = vmul.f32 %v1434_v25, %v1376_v3  ;;  %v554_v28 = vmul.f32 %v1436_v26, %v1368_v0  ;;  %v445_v29 = vmul.f32 %v1403_v14, %v318_v13 }
  0x3a   : > { %v1446_v30 = vstv %s1035_s11  ;;  %v555_v33 = vmul.f32 %v1436_v26, %v317_v7  ;;  %v557_v35 = vmul.f32 %v1436_v26, %v318_v13  ;;  %v556_v36 = vmul.f32 %v1436_v26, %v1406_v15 }
  0x3b   : > { %v703_v31 = vmul.f32 %v1446_v30, %v317_v7  ;;  %v702_v32 = vmul.f32 %v1446_v30, %v1368_v0  ;;  %v704_v34 = vmul.f32 %v1446_v30, %v1406_v15  ;;  %v487_v39 = vmul.f32 %v1053_v37, %v1376_v3  ;;  %v1527_v7 = vld [vmem:[%s1357_s25 + $0xb0] sm:$0xff] }
  0x3c   : > { %v486_v40 = vmul.f32 %v1465_v38, %v1376_v3  ;;  %v705_v41 = vmul.f32 %v1446_v30, %v318_v13  ;;  %v746_v42 = vmul.f32 %v1465_v38, %v1436_v26  ;;  %v599_v43 = vmul.f32 %v1053_v37, %v1403_v14 }
  0x3d   : > { %v598_v44 = vmul.f32 %v1465_v38, %v1403_v14  ;;  %v489_v47 = vmul.f32 %v1054_v45, %v1376_v3  ;;  %v488_v48 = vmul.f32 %v1484_v46, %v1376_v3  ;;  %v747_v49 = vmul.f32 %v1053_v37, %v1436_v26 }
  0x3e   : > { %v1493_v50 = vstv %s290_s18  ;;  %v748_v51 = vmul.f32 %v1484_v46, %v1436_v26  ;;  %v601_v52 = vmul.f32 %v1054_v45, %v1403_v14  ;;  %v339_v54 = vmul.f32 %v1465_v38, %v1446_v30 }
  0x3f   : > { %390 = vrot.lane.b32.xlu2 %v369_v10, %s1237_s29  ;;  %386 = vrot.lane.b32.xlu1 %v367_v11, %s1237_s29  ;;  %v334_v53 = vmul.f32 %v1493_v50, %v1368_v0  ;;  %v600_v55 = vmul.f32 %v1484_v46, %v1403_v14  ;;  %v348_v58 = vmul.f32 %v1505_v56, %v1436_v26 }
  0x40   : > { %382 = vrot.lane.b32.xlu0 %v365_v12, %s1237_s29  ;;  %v551_v61 = vmul.f32 %v1436_v26, %v1392_v9  ;;  %v550_v62 = vmul.f32 %v1436_v26, %v1374_v2  ;;  %v357_v0 = vmul.f32 %v1513_v59, %v1403_v14  ;;  %v749_v4 = vmul.f32 %v1054_v45, %v1436_v26  ;;  %v1532_v12 = vld [vmem:[%s1357_s25 + $0xf0] sm:$0xff] }
  0x41   : > { %v343_v57 = vadd.f32 %v339_v54, %v334_v53  ;;  %v335_v5 = vmul.f32 %v1493_v50, %v1406_v15  ;;  %v340_v6 = vmul.f32 %v1484_v46, %v1446_v30  ;;  %v349_v13 = vmul.f32 %v1527_v7, %v1436_v26  ;;  %v1057_v15 = vld [vmem:[%s1357_s25 + $0xa8] sm:$0xff] }
  0x42   : > { %v552_v37 = vmul.f32 %v1436_v26, %v1371_v1  ;;  %v1051_v53 = vld [vmem:[%s1357_s25 + $0x48] sm:$0xff] }
  0x43   : > { %v352_v63 = vadd.f32 %v348_v58, %v343_v57  ;;  %v344_v10 = vadd.f32 %v340_v6, %v335_v5  ;;  %v545_v5 = vmul.f32 %v1532_v12, %v1446_v30 }
  0x45   : > { %v361_v11 = vadd.f32 %v357_v0, %v352_v63  ;;  %v420_v63 = vmul.f32 %v1465_v38, %v1493_v50  ;;  %v424_v0 = vmul.f32 %v1505_v56, %v1446_v30  ;;  %v595_v38 = vmul.f32 %v1051_v53, %v1403_v14 }
  0x47   : > { %394 = vrot.lane.b32.xlu1 %v371_v16, %s1237_s29  ;;  %454 = vrot.lane.b32.xlu2 %v438_v17, %s1237_s29  ;;  %v358_v16 = vmul.f32 %v1532_v12, %v1403_v14 }
  0x48   : > { %392 = vrot.lane.b32.xlu0 %v370_v18, %s1237_s29  ;;  %v353_v18 = vadd.f32 %v349_v13, %v344_v10 }
  0x4f   : > { %458 = vrot.lane.b32.xlu1 %v440_v19, %s1237_s29  ;;  %460 = vrot.lane.b32.xlu2 %v441_v20, %s1237_s29 }
  0x50   : > { %456 = vrot.lane.b32.xlu0 %v439_v21, %s1237_s29  ;;  %v643_v21 = vmul.f32 %v1057_v15, %v1376_v3 }
  0x57   : > { %464 = vrot.lane.b32.xlu1 %v443_v22, %s1237_s29  ;;  %466 = vrot.lane.b32.xlu2 %v444_v23, %s1237_s29  ;;  %v698_v22 = vmul.f32 %v1446_v30, %v1374_v2  ;;  %v362_v23 = vadd.f32 %v358_v16, %v353_v18  ;;  %v428_v18 = vadd.f32 %v424_v0, %v420_v63 }
  0x58   : > { %462 = vrot.lane.b32.xlu0 %v442_v24, %s1237_s29  ;;  %v642_v24 = vmul.f32 %v1505_v56, %v1376_v3 }
  0x5f   : > { %498 = vrot.lane.b32.xlu1 %v482_v27, %s1237_s29  ;;  %574 = vrot.lane.b32.xlu2 %v554_v28, %s1237_s29  ;;  %v790_v28 = vmul.f32 %v1505_v56, %v1403_v14 }
  0x60   : > { %468 = vrot.lane.b32.xlu0 %v445_v29, %s1237_s29  ;;  %v791_v29 = vmul.f32 %v1057_v15, %v1403_v14 }
  0x67   : > { %724 = vrot.lane.b32.xlu2 %v703_v31, %s1237_s29  ;;  %722 = vrot.lane.b32.xlu1 %v702_v32, %s1237_s29  ;;  %v699_v31 = vmul.f32 %v1446_v30, %v1392_v9  ;;  %v421_v9 = vmul.f32 %v1484_v46, %v1493_v50 }
  0x68   : > { %576 = vrot.lane.b32.xlu0 %v555_v33, %s1237_s29 }
  0x6f   : > { %726 = vrot.lane.b32.xlu2 %v704_v34, %s1237_s29  ;;  %580 = vrot.lane.b32.xlu1 %v557_v35, %s1237_s29  ;;  %v553_v35 = vmul.f32 %v1436_v26, %v1389_v8 }
  0x70   : > { %578 = vrot.lane.b32.xlu0 %v556_v36, %s1237_s29  ;;  %v644_v36 = vmul.f32 %v1527_v7, %v1376_v3 }
  0x77   : > { %508 = vrot.lane.b32.xlu2 %v487_v39, %s1237_s29  ;;  %506 = vrot.lane.b32.xlu1 %v486_v40, %s1237_s29  ;;  %v425_v39 = vmul.f32 %v1527_v7, %v1446_v30 }
  0x78   : > { %728 = vrot.lane.b32.xlu0 %v705_v41, %s1237_s29  ;;  %v433_v41 = vmul.f32 %v1532_v12, %v1436_v26 }
  0x79   : > { %v429_v40 = vadd.f32 %v425_v39, %v421_v9 }
  0x7f   : > { %766 = vrot.lane.b32.xlu2 %v746_v42, %s1237_s29  ;;  %620 = vrot.lane.b32.xlu1 %v599_v43, %s1237_s29 }
  0x80   : > { %618 = vrot.lane.b32.xlu0 %v598_v44, %s1237_s29  ;;  %v1058_v44 = vld [vmem:[%s1357_s25 + $0xb8] sm:$0xff] }
  0x87   : > { %512 = vrot.lane.b32.xlu2 %v489_v47, %s1237_s29  ;;  %510 = vrot.lane.b32.xlu1 %v488_v48, %s1237_s29  ;;  %v437_v47 = vadd.f32 %v433_v41, %v429_v40 }
  0x88   : > { %768 = vrot.lane.b32.xlu0 %v747_v49, %s1237_s29  ;;  %v700_v49 = vmul.f32 %v1446_v30, %v1371_v1 }
  0x8f   : > { %770 = vrot.lane.b32.xlu2 %v748_v51, %s1237_s29  ;;  %624 = vrot.lane.b32.xlu1 %v601_v52, %s1237_s29  ;;  %v701_v51 = vmul.f32 %v1446_v30, %v1389_v8  ;;  %v645_v52 = vmul.f32 %v1058_v44, %v1376_v3  ;;  %v792_v8 = vmul.f32 %v1527_v7, %v1403_v14 }
  0x90   : > { %622 = vrot.lane.b32.xlu0 %v600_v55, %s1237_s29 }
  0x91   : > { %v389_v60 = vpop.permute.xlu2 %388 }
  0x97   : > { %568 = vrot.lane.b32.xlu2 %v551_v61, %s1237_s29  ;;  %566 = vrot.lane.b32.xlu1 %v550_v62, %s1237_s29  ;;  %v483_v61 = vmul.f32 %v1051_v53, %v1376_v3 }
  0x98   : > { %772 = vrot.lane.b32.xlu0 %v749_v4, %s1237_s29  ;;  %v541_v4 = vmul.f32 %v1527_v7, %v1493_v50  ;;  %v594_v7 = vmul.f32 %v1434_v25, %v1403_v14 }
  0x99   : > { %v391_v17 = vpop.permute.xlu2 %390 }
  0x9a   : > { %v399_v19 = vsel %vm396_vm0, %v389_v60, %v391_v17  ;;  %v793_v60 = vmul.f32 %v1058_v44, %v1403_v14  ;;  %v549_v15 = vadd.f32 %v545_v5, %v541_v4  ;;  %v742_v17 = vmul.f32 %v1434_v25, %v1436_v26 }
  0x9b   : > { %v1541_v20 = vadd.f32 %v399_v19, %v361_v11  ;;  %v432_v19 = vmul.f32 %v1513_v59, %v1436_v26 }
  0x9f   : > { %664 = vrot.lane.b32.xlu1 %v643_v21, %s1237_s29  ;;  %714 = vrot.lane.b32.xlu2 %v698_v22, %s1237_s29  ;;  %v436_v21 = vadd.f32 %v432_v19, %v428_v18  ;;  %v1061_v22 = vld [vmem:[%s1357_s25 + $0xe8] sm:$0xff] }
  0xa0   : > { %662 = vrot.lane.b32.xlu0 %v642_v24, %s1237_s29  ;;  %v1055_v19 = vld [vmem:[%s1357_s25 + $0x88] sm:$0xff] }
  0xa1   : > { %v455_v27 = vpop.permute.xlu2 %454 }
  0xa7   : > { %810 = vrot.lane.b32.xlu1 %v790_v28, %s1237_s29  ;;  %812 = vrot.lane.b32.xlu2 %v791_v29, %s1237_s29  ;;  %v834_v29 = vmul.f32 %v1513_v59, %v1376_v3 }
  0xa8   : > { %716 = vrot.lane.b32.xlu0 %v699_v31, %s1237_s29  ;;  %v835_v31 = vmul.f32 %v1061_v22, %v1376_v3 }
  0xa9   : > { %v385_v32 = vpop.permute.xlu1 %384  ;;  %v461_v33 = vpop.permute.xlu2 %460 }
  0xaa   : > { %v381_v34 = vpop.permute.xlu0 %380 }
  0xaf   : > { %572 = vrot.lane.b32.xlu1 %v553_v35, %s1237_s29  ;;  %666 = vrot.lane.b32.xlu2 %v644_v36, %s1237_s29 }
  0xb0   : > { %570 = vrot.lane.b32.xlu0 %v552_v37, %s1237_s29  ;;  %v1637_v37 = vld [vmem:[%s1357_s25 + $0x50] sm:$0xff] }
  0xb1   : > { %v387_v42 = vpop.permute.xlu1 %386  ;;  %v467_v43 = vpop.permute.xlu2 %466  ;;  %v596_v41 = vmul.f32 %v1637_v37, %v1403_v14  ;;  %v484_v44 = vmul.f32 %v1637_v37, %v1376_v3 }
  0xb2   : > { %v1576_v45 = vsel %vm396_vm0, %v385_v32, %v387_v42  ;;  %v383_v46 = vpop.permute.xlu0 %382 }
  0xb3   : > { %v1579_v48 = vsel %vm396_vm0, %v381_v34, %v383_v46  ;;  %v1052_v34 = vld [vmem:[%s1357_s25 + $0x58] sm:$0xff]  ;;  %v540_v46 = vmul.f32 %v1505_v56, %v1493_v50 }
  0xb4   : > { %v485_v40 = vmul.f32 %v1052_v34, %v1376_v3 }
  0xb7   : > { %718 = vrot.lane.b32.xlu1 %v700_v49, %s1237_s29  ;;  %720 = vrot.lane.b32.xlu2 %v701_v51, %s1237_s29  ;;  %v544_v49 = vmul.f32 %v1513_v59, %v1446_v30 }
  0xb8   : > { %668 = vrot.lane.b32.xlu0 %v645_v52, %s1237_s29 }
  0xb9   : > { %v395_v54 = vpop.permute.xlu1 %394  ;;  %v575_v55 = vpop.permute.xlu2 %574 }
  0xba   : > { %v393_v57 = vpop.permute.xlu0 %392 }
  0xbb   : > { %v400_v58 = vsel %vm396_vm0, %v393_v57, %v395_v54  ;;  %v744_v54 = vmul.f32 %v1637_v37, %v1436_v26  ;;  %v745_v57 = vmul.f32 %v1052_v34, %v1436_v26 }
  0xbc   : > { %v1593_v62 = vadd.f32 %v400_v58, %v362_v23 }
  0xbf   : > { %816 = vrot.lane.b32.xlu1 %v793_v60, %s1237_s29  ;;  %500 = vrot.lane.b32.xlu2 %v483_v61, %s1237_s29  ;;  %v597_v60 = vmul.f32 %v1052_v34, %v1403_v14  ;;  %v1062_v61 = vld [vmem:[%s1357_s25 + $0xf8] sm:$0xff] }
  0xc0   : > { %814 = vrot.lane.b32.xlu0 %v792_v8, %s1237_s29  ;;  %v837_v5 = vmul.f32 %v1062_v61, %v1376_v3 }
  0xc1   : > { %v459_v6 = vpop.permute.xlu1 %458  ;;  %v725_v10 = vpop.permute.xlu2 %724 }
  0xc2   : > { %v1609_v11 = vsel %vm396_vm0, %v459_v6, %v461_v33  ;;  %v457_v13 = vpop.permute.xlu0 %456  ;;  %v743_v33 = vmul.f32 %v1051_v53, %v1436_v26 }
  0xc3   : > { %v1612_v16 = vsel %vm396_vm0, %v455_v27, %v457_v13  ;;  %v836_v13 = vmul.f32 %v1532_v12, %v1376_v3 }
  0xc7   : > { %612 = vrot.lane.b32.xlu1 %v595_v38, %s1237_s29  ;;  %758 = vrot.lane.b32.xlu2 %v742_v17, %s1237_s29  ;;  %v1679_v38 = vstv %s295_s20  ;;  %v697_v17 = vmul.f32 %v1532_v12, %v1493_v50  ;;  %v787_v12 = vmul.f32 %v1055_v19, %v1403_v14 }
  0xc8   : > { %610 = vrot.lane.b32.xlu0 %v594_v7, %s1237_s29 }
  0xc9   : > { %v465_v23 = vpop.permute.xlu1 %464  ;;  %v727_v24 = vpop.permute.xlu2 %726 }
  0xca   : > { %v463_v27 = vpop.permute.xlu0 %462 }
  0xcb   : > { %v472_v28 = vsel %vm396_vm0, %v463_v27, %v465_v23 }
  0xcc   : > { %v480_v32 = vadd.f32 %v472_v28, %v436_v21 }
  0xcf   : > { %854 = vrot.lane.b32.xlu1 %v834_v29, %s1237_s29  ;;  %856 = vrot.lane.b32.xlu2 %v835_v31, %s1237_s29  ;;  %v639_v31 = vmul.f32 %v1055_v19, %v1376_v3 }
  0xd0   : > { %760 = vrot.lane.b32.xlu0 %v743_v33, %s1237_s29 }
  0xd1   : > { %v1634_v35 = vpop.permute.xlu1 %498  ;;  %v509_v36 = vpop.permute.xlu2 %508 }
  0xd2   : > { %v469_v9 = vpop.permute.xlu0 %468 }
  0xd3   : > { %v473_v39 = vsel %vm396_vm0, %v467_v43, %v469_v9  ;;  %v548_v43 = vadd.f32 %v544_v49, %v540_v46 }
  0xd4   : > { %v1643_v42 = vadd.f32 %v473_v39, %v437_v47  ;;  %v1707_v39 = vld [vmem:[%s1357_s25 + $0x90] sm:$0xff] }
  0xd5   : > { %v788_v46 = vmul.f32 %v1707_v39, %v1403_v14 }
  0xd7   : > { %504 = vrot.lane.b32.xlu1 %v485_v40, %s1237_s29  ;;  %614 = vrot.lane.b32.xlu2 %v596_v41, %s1237_s29 }
  0xd8   : > { %502 = vrot.lane.b32.xlu0 %v484_v44, %s1237_s29 }
  0xd9   : > { %v1654_v51 = vpop.permute.xlu2 %766  ;;  %v723_v47 = vpop.permute.xlu1 %722 }
  0xda   : > { %v577_v52 = vpop.permute.xlu0 %576  ;;  %v1657_v53 = vsel %vm396_vm0, %v723_v47, %v725_v10  ;;  %v696_v47 = vmul.f32 %v1513_v59, %v1493_v50 }
  0xdb   : > { %v584_v56 = vsel %vm396_vm0, %v575_v55, %v577_v52  ;;  %v1669_v55 = vld [vmem:[%s1357_s25 + $0x80] sm:$0xff]  ;;  %v1059_v52 = vld [vmem:[%s1357_s25 + $0xc8] sm:$0xff] }
  0xdc   : > { %v592_v58 = vadd.f32 %v584_v56, %v548_v43  ;;  %v638_v6 = vmul.f32 %v1669_v55, %v1376_v3  ;;  %v786_v28 = vmul.f32 %v1669_v55, %v1403_v14  ;;  %v640_v43 = vmul.f32 %v1707_v39, %v1376_v3 }
  0xdf   : > { %762 = vrot.lane.b32.xlu1 %v744_v54, %s1237_s29  ;;  %764 = vrot.lane.b32.xlu2 %v745_v57, %s1237_s29  ;;  %v1726_v57 = vld [vmem:[%s1357_s25 + $0xc0] sm:$0xff] }
  0xe0   : > { %616 = vrot.lane.b32.xlu0 %v597_v60, %s1237_s29  ;;  %v740_v60 = vadd.f32 %v1657_v53, %v696_v47 }
  0xe1   : > { %v513_v8 = vpop.permute.xlu2 %512  ;;  %v581_v63 = vpop.permute.xlu1 %580 }
  0xe2   : > { %v579_v0 = vpop.permute.xlu0 %578 }
  0xe3   : > { %v585_v4 = vsel %vm396_vm0, %v579_v0, %v581_v63 }
  0xe4   : > { %v1675_v10 = vadd.f32 %v585_v4, %v549_v15  ;;  %v412_v15 = vadd.f32 %v1679_v38, %v1541_v20  ;;  %v830_v4 = vmul.f32 %v1726_v57, %v1376_v3 }
  0xe6   : > { %v416_v34 = vmax.f32 %v412_v15, 0.0  ;;  %v1751_v15 = vld [vmem:[%s1357_s25 + $0xd0] sm:$0xff] }
  0xe7   : > { %860 = vrot.lane.b32.xlu1 %v837_v5, %s1237_s29  ;;  %654 = vrot.lane.b32.xlu2 %v638_v6, %s1237_s29  ;;  %v831_v5 = vmul.f32 %v1059_v52, %v1376_v3 }
  0xe8   : > { %858 = vrot.lane.b32.xlu0 %v836_v13, %s1237_s29 }
  0xe9   : > { %v1686_v7 = vpop.permute.xlu2 %770  ;;  %v507_v18 = vpop.permute.xlu1 %506 }
  0xea   : > { %v729_v21 = vpop.permute.xlu0 %728  ;;  %v516_v22 = vsel %vm396_vm0, %v507_v18, %v509_v36 }
  0xeb   : > { %v733_v23 = vsel %vm396_vm0, %v727_v24, %v729_v21  ;;  %v524_v27 = vadd.f32 %v516_v22, %v480_v32  ;;  %v1056_v24 = vld [vmem:[%s1357_s25 + $0x98] sm:$0xff] }
  0xec   : > { %v1696_v29 = vadd.f32 %v733_v23, %v697_v17  ;;  %v641_v44 = vmul.f32 %v1056_v24, %v1376_v3 }
  0xed   : > { %v528_v33 = vadd.f32 %v524_v27, %v1679_v38  ;;  %v832_v27 = vmul.f32 %v1751_v15, %v1376_v3 }
  0xef   : > { %v532_v20 = vmax.f32 %v528_v33, 0.0  ;;  %802 = vrot.lane.b32.xlu1 %v786_v28, %s1237_s29  ;;  %804 = vrot.lane.b32.xlu2 %v787_v12, %s1237_s29  ;;  %v332_v28 = vmul.f32 %v1493_v50, %v1374_v2  ;;  %v337_v12 = vmul.f32 %v1434_v25, %v1446_v30 }
  0xf0   : > { %656 = vrot.lane.b32.xlu0 %v639_v31, %s1237_s29 }
  0xf1   : > { %v569_v32 = vpop.permute.xlu2 %568  ;;  %v621_v36 = vpop.permute.xlu1 %620  ;;  %v1704_v9 = vmax.f32 %v416_v34, %v532_v20  ;;  %v341_v20 = vadd.f32 %v337_v12, %v332_v28 }
  0xf2   : > { %v619_v40 = vpop.permute.xlu0 %618 }
  0xf3   : > { %v628_v41 = vsel %vm396_vm0, %v619_v40, %v621_v36  ;;  %v901_v36 = vld [vmem:[%s1959_s3 + $0x78] sm:$0xff]  ;;  %v418_v40 = vmul.f32 %v1434_v25, %v1493_v50  ;;  %v899_v25 = vld [vmem:[%s1959_s3 + $0x68] sm:$0xff] }
  0xf4   : > { %v1713_v49 = vadd.f32 %v628_v41, %v592_v58  ;;  %v413_v58 = vadd.f32 %v1679_v38, %v1593_v62  ;;  %v789_v62 = vmul.f32 %v1056_v24, %v1403_v14  ;;  %1068 = vmatpush.msra.mxu2 %v901_v36  ;;  %1069 = vmatpush.msra.mxu3 %v901_v36  ;;  %v900_v41 = vld [vmem:[%s1959_s3 + $0x70] sm:$0xff] }
  0xf5   : > { %906 = vmatpush.msra.mxu0 %v901_v36  ;;  %1067 = vmatpush.msra.mxu1 %v901_v36  ;;  %v889_v36 = vld [vmem:[%s1959_s3 + $0x18] sm:$0xff] }
  0xf6   : > { %v417_v13 = vmax.f32 %v413_v58, 0.0  ;;  %1071 = vmatpush.msra.mxu2 %v900_v41  ;;  %1072 = vmatpush.msra.mxu3 %v900_v41 }
  0xf7   : > { %660 = vrot.lane.b32.xlu1 %v641_v44, %s1237_s29  ;;  %806 = vrot.lane.b32.xlu2 %v788_v46, %s1237_s29  ;;  %v430_v46 = vmul.f32 %v1726_v57, %v1436_v26 }
  0xf8   : > { %658 = vrot.lane.b32.xlu0 %v640_v43, %s1237_s29  ;;  %907 = vmatpush.msra.mxu0 %v900_v41 }
  0xf9   : > { %v511_v56 = vpop.permute.xlu1 %510  ;;  %v1723_v54 = vpop.permute.xlu2 %714  ;;  %1070 = vmatpush.msra.mxu1 %v900_v41  ;;  %1074 = vmatpush.msra.mxu2 %v899_v25 }
  0xfa   : > { %v769_v61 = vpop.permute.xlu0 %768  ;;  %v517_v59 = vsel %vm396_vm0, %v511_v56, %v513_v8  ;;  %1075 = vmatpush.msra.mxu3 %v899_v25  ;;  %v898_v56 = vld [vmem:[%s1959_s3 + $0x60] sm:$0xff]  ;;  %908 = vmatpush.msra.mxu0 %v899_v25 }
  0xfb   : > { %v776_v63 = vsel %vm396_vm0, %v1654_v51, %v769_v61  ;;  %v525_v0 = vadd.f32 %v517_v59, %v1643_v42  ;;  %v1060_v42 = vld [vmem:[%s1357_s25 + $0xd8] sm:$0xff]  ;;  %1073 = vmatpush.msra.mxu1 %v899_v25  ;;  %1077 = vmatpush.msra.mxu2 %v898_v56  ;;  %s1033_s25 = sshll.u32 %s1019_s2, 2 }
  0xfc   : > { %v1738_v6 = vadd.f32 %v776_v63, %v740_v60  ;;  %v833_v22 = vmul.f32 %v1060_v42, %v1376_v3  ;;  %v346_v3 = vmul.f32 %v1669_v55, %v1436_v26  ;;  %1078 = vmatpush.msra.mxu3 %v898_v56  ;;  %v897_v59 = vld [vmem:[%s1959_s3 + $0x58] sm:$0xff]  ;;  %v896_v63 = vld [vmem:[%s1959_s3 + $0x50] sm:$0xff]  ;;  %909 = vmatpush.msra.mxu0 %v898_v56  ;;  %p285_p13 = scmp.lt.s32.totalorder %s1033_s25, 7 }
  0xfd   : > { %v529_v53 = vadd.f32 %v525_v0, %v1679_v38  ;;  %1076 = vmatpush.msra.mxu1 %v898_v56  ;;  %1080 = vmatpush.msra.mxu2 %v897_v59 }
  0xfe   : > { %1081 = vmatpush.msra.mxu3 %v897_v59  ;;  %910 = vmatpush.msra.mxu0 %v897_v59  ;;  %s1971_s25 = smov (!%p285_p13, %s1033_s25), 7 }
  0xff   : > { %v533_v17 = vmax.f32 %v529_v53, 0.0  ;;  %846 = vrot.lane.b32.xlu1 %v830_v4, %s1237_s29  ;;  %848 = vrot.lane.b32.xlu2 %v831_v5, %s1237_s29  ;;  %v895_v5 = vld [vmem:[%s1959_s3 + $0x48] sm:$0xff]  ;;  %s1034_s28 = sshll.u32 %s1971_s25, 3 }
 0x100   : > { %808 = vrot.lane.b32.xlu0 %v789_v62, %s1237_s29  ;;  %1079 = vmatpush.msra.mxu1 %v897_v59  ;;  %v333_v59 = vmul.f32 %v1493_v50, %v1371_v1  ;;  %s288_s18 = scalar_lea.vmem %s1961_s5, %s1034_s28 }
 0x101   : > { %v625_v51 = vpop.permute.xlu1 %624  ;;  %v1746_v8 = vpop.permute.xlu2 %812  ;;  %v1748_v18 = vmax.f32 %v417_v13, %v533_v17  ;;  %1083 = vmatpush.msra.mxu2 %v896_v63  ;;  %1084 = vmatpush.msra.mxu3 %v896_v63 }
 0x102   : > { %v623_v19 = vpop.permute.xlu0 %622  ;;  %911 = vmatpush.msra.mxu0 %v896_v63  ;;  %1082 = vmatpush.msra.mxu1 %v896_v63 }
 0x103   : > { %v629_v21 = vsel %vm396_vm0, %v623_v19, %v625_v51  ;;  %1086 = vmatpush.msra.mxu2 %v895_v5  ;;  %1087 = vmatpush.msra.mxu3 %v895_v5 }
 0x104   : > { %v1756_v23 = vadd.f32 %v629_v21, %v1675_v10  ;;  %912 = vmatpush.msra.mxu0 %v895_v5  ;;  %1085 = vmatpush.msra.mxu1 %v895_v5 }
 0x107   : > { %852 = vrot.lane.b32.xlu1 %v833_v22, %s1237_s29 }
 0x108   : > { %850 = vrot.lane.b32.xlu0 %v832_v27, %s1237_s29 }
 0x109   : > { %v567_v31 = vpop.permute.xlu1 %566  ;;  %v1766_v33 = vpop.permute.xlu2 %666 }
 0x10a   : > { %v773_v34 = vpop.permute.xlu0 %772  ;;  %v1769_v10 = vsel %vm396_vm0, %v567_v31, %v569_v32  ;;  %v422_v32 = vmul.f32 %v1669_v55, %v1446_v30 }
 0x10b   : > { %v777_v2 = vsel %vm396_vm0, %v1686_v7, %v773_v34  ;;  %v350_v7 = vadd.f32 %v346_v3, %v341_v20  ;;  %v890_v3 = vld [vmem:[%s1959_s3 + $0x20] sm:$0xff] }
 0x10c   : > { %v1776_v24 = vadd.f32 %v777_v2, %v1696_v29  ;;  %v355_v29 = vmul.f32 %v1726_v57, %v1403_v14  ;;  %v426_v44 = vadd.f32 %v422_v32, %v418_v40  ;;  %v888_v40 = vld [vmem:[%s1959_s3 + $0x10] sm:$0xff]  ;;  %v887_v32 = vld [vmem:[%s1959_s3 + $0x8] sm:$0xff] }
 0x10e   : > { %v359_v58 = vadd.f32 %v355_v29, %v350_v7  ;;  %v434_v0 = vadd.f32 %v430_v46, %v426_v44  ;;  %v886_v44 = vld [vmem:[%s1959_s3] sm:$0xff] }
 0x110   : > { %v478_v53 = vadd.f32 %v1612_v16, %v434_v0 }
 0x111   : > { %v665_v43 = vpop.permute.xlu1 %664  ;;  %v1795_v47 = vpop.permute.xlu2 %720 }
 0x112   : > { %v663_v52 = vpop.permute.xlu0 %662 }
 0x113   : > { %v672_v60 = vsel %vm396_vm0, %v663_v52, %v665_v43 }
 0x114   : > { %v680_v61 = vadd.f32 %v672_v60, %v1713_v49  ;;  %v405_v49 = vadd.f32 %v1579_v48, %v359_v58  ;;  %v894_v48 = vld [vmem:[%s1959_s3 + $0x40] sm:$0xff] }
 0x115   : > { %1089 = vmatpush.msra.mxu2 %v894_v48  ;;  %1090 = vmatpush.msra.mxu3 %v894_v48 }
 0x116   : > { %v684_v4 = vadd.f32 %v680_v61, %v1679_v38  ;;  %v410_v16 = vadd.f32 %v1679_v38, %v405_v49  ;;  %913 = vmatpush.msra.mxu0 %v894_v48  ;;  %1088 = vmatpush.msra.mxu1 %v894_v48  ;;  %v419_v49 = vmul.f32 %v1637_v37, %v1493_v50 }
 0x117   : > { %v431_v48 = vmul.f32 %v1751_v15, %v1436_v26 }
 0x118   : > { %v688_v62 = vmax.f32 %v684_v4, 0.0  ;;  %v414_v28 = vmax.f32 %v410_v16, 0.0 }
 0x119   : > { %v1814_v13 = vpop.permute.xlu1 %810  ;;  %v501_v17 = vpop.permute.xlu2 %500 }
 0x11a   : > { %v717_v42 = vpop.permute.xlu0 %716  ;;  %v514_v51 = vsel %vm396_vm0, %v1634_v35, %v501_v17  ;;  %v1822_v19 = vmax.f32 %v1704_v9, %v688_v62  ;;  %v893_v35 = vld [vmem:[%s1959_s3 + $0x38] sm:$0xff]  ;;  %v892_v9 = vld [vmem:[%s1959_s3 + $0x30] sm:$0xff]  ;;  %v820_v1 = vsel %vm396_vm0, %v1814_v13, %v1746_v8 }
 0x11b   : > { %v1827_v21 = vsel %vm396_vm0, %v1723_v54, %v717_v42  ;;  %v522_v22 = vadd.f32 %v514_v51, %v478_v53  ;;  %1092 = vmatpush.msra.mxu2 %v893_v35  ;;  %1093 = vmatpush.msra.mxu3 %v893_v35  ;;  %v891_v54 = vld [vmem:[%s1959_s3 + $0x28] sm:$0xff]  ;;  %v356_v53 = vmul.f32 %v1751_v15, %v1403_v14 }
 0x11c   : > { %914 = vmatpush.msra.mxu0 %v893_v35  ;;  %1091 = vmatpush.msra.mxu1 %v893_v35  ;;  %v828_v17 = vadd.f32 %v820_v1, %v1738_v6 }
 0x11d   : > { %v526_v27 = vadd.f32 %v522_v22, %v1679_v38  ;;  %1095 = vmatpush.msra.mxu2 %v892_v9  ;;  %1096 = vmatpush.msra.mxu3 %v892_v9 }
 0x11e   : > { %915 = vmatpush.msra.mxu0 %v892_v9  ;;  %1094 = vmatpush.msra.mxu1 %v892_v9 }
 0x11f   : > { %v530_v12 = vmax.f32 %v526_v27, 0.0  ;;  %1098 = vmatpush.msra.mxu2 %v891_v54  ;;  %1099 = vmatpush.msra.mxu3 %v891_v54 }
 0x120   : > { %916 = vmatpush.msra.mxu0 %v891_v54  ;;  %1097 = vmatpush.msra.mxu1 %v891_v54 }
 0x121   : > { %v573_v31 = vpop.permute.xlu1 %572  ;;  %v1839_v34 = vmax.f32 %v414_v28, %v530_v12  ;;  %1101 = vmatpush.msra.mxu2 %v890_v3  ;;  %1102 = vmatpush.msra.mxu3 %v890_v3  ;;  %v1856_v7 = vpop.permute.xlu2 %758 }
 0x122   : > { %v571_v20 = vpop.permute.xlu0 %570  ;;  %917 = vmatpush.msra.mxu0 %v890_v3  ;;  %1100 = vmatpush.msra.mxu1 %v890_v3 }
 0x123   : > { %v1845_v2 = vsel %vm396_vm0, %v571_v20, %v573_v31  ;;  %1104 = vmatpush.msra.mxu2 %v889_v36  ;;  %1105 = vmatpush.msra.mxu3 %v889_v36 }
 0x124   : > { %918 = vmatpush.msra.mxu0 %v889_v36  ;;  %1103 = vmatpush.msra.mxu1 %v889_v36 }
 0x125   : > { %1107 = vmatpush.msra.mxu2 %v888_v40  ;;  %1108 = vmatpush.msra.mxu3 %v888_v40 }
 0x126   : > { %919 = vmatpush.msra.mxu0 %v888_v40  ;;  %1106 = vmatpush.msra.mxu1 %v888_v40 }
 0x127   : > { %1110 = vmatpush.msra.mxu2 %v887_v32  ;;  %1111 = vmatpush.msra.mxu3 %v887_v32 }
 0x128   : > { %920 = vmatpush.msra.mxu0 %v887_v32  ;;  %1109 = vmatpush.msra.mxu1 %v887_v32 }
 0x129   : > { %v719_v41 = vpop.permute.xlu1 %718  ;;  %1113 = vmatpush.msra.mxu2 %v886_v44  ;;  %1114 = vmatpush.msra.mxu3 %v886_v44  ;;  %v857_v61 = vpop.permute.xlu2 %856 }
 0x12a   : > { %v1860_v29 = vsel %vm396_vm0, %v719_v41, %v1795_v47  ;;  %v669_v25 = vpop.permute.xlu0 %668  ;;  %921 = vmatpush.msra.mxu0 %v886_v44  ;;  %1112 = vmatpush.msra.mxu1 %v886_v44 }
 0x12b   : > { %v673_v46 = vsel %vm396_vm0, %v1766_v33, %v669_v25  ;;  %v338_v33 = vmul.f32 %v1637_v37, %v1446_v30 }
 0x12c   : > { %v681_v43 = vadd.f32 %v673_v46, %v1756_v23  ;;  %v347_v23 = vmul.f32 %v1707_v39, %v1436_v26 }
 0x12d   : > { %v342_v4 = vadd.f32 %v338_v33, %v333_v59 }
 0x12e   : > { %v685_v52 = vadd.f32 %v681_v43, %v1679_v38 }
 0x12f   : > { %v351_v62 = vadd.f32 %v347_v23, %v342_v4 }
 0x130   : > { %v689_v47 = vmax.f32 %v685_v52, 0.0 }
 0x131   : > { %v817_v56 = vpop.permute.xlu1 %816  ;;  %v615_v5 = vpop.permute.xlu2 %614  ;;  %v360_v35 = vadd.f32 %v356_v53, %v351_v62 }
 0x132   : > { %v815_v58 = vpop.permute.xlu0 %814  ;;  %v693_v60 = vmax.f32 %v1748_v18, %v689_v47  ;;  %v423_v18 = vmul.f32 %v1707_v39, %v1446_v30 }
 0x133   : > { %v406_v14 = vadd.f32 %v1576_v45, %v360_v35  ;;  %v821_v44 = vsel %vm396_vm0, %v815_v58, %v817_v56  ;;  %v543_v58 = vmul.f32 %v1751_v15, %v1446_v30 }
 0x134   : > { %v427_v51 = vadd.f32 %v423_v18, %v419_v49  ;;  %v829_v43 = vadd.f32 %v821_v44, %v1776_v24 }
 0x135   : > { %v411_v31 = vadd.f32 %v1679_v38, %v406_v14 }
 0x136   : > { %v435_v27 = vadd.f32 %v431_v48, %v427_v51 }
 0x137   : > { %v415_v36 = vmax.f32 %v411_v31, 0.0 }
 0x138   : > { %v479_v28 = vadd.f32 %v1609_v11, %v435_v27  ;;  %v538_v11 = vmul.f32 %v1669_v55, %v1493_v50  ;;  %v539_v55 = vmul.f32 %v1707_v39, %v1493_v50 }
 0x139   : > { %v613_v63 = vpop.permute.xlu1 %612  ;;  %v1890_v13 = vpop.permute.xlu2 %764 }
 0x13a   : > { %v611_v0 = vpop.permute.xlu0 %610 }
 0x13b   : > { %v626_v23 = vsel %vm396_vm0, %v611_v0, %v613_v63 }
 0x141   : > { %v855_v42 = vpop.permute.xlu1 %854  ;;  %v655_v41 = vpop.permute.xlu2 %654 }
 0x142   : > { %v761_v16 = vpop.permute.xlu0 %760  ;;  %v864_v37 = vsel %vm396_vm0, %v855_v42, %v857_v61 }
 0x143   : > { %v872_v22 = vadd.f32 %v864_v37, %v828_v17  ;;  %v547_v17 = vadd.f32 %v543_v58, %v539_v55 }
 0x145   : > { %v876_v9 = vadd.f32 %v872_v22, %v1679_v38  ;;  %v591_v39 = vadd.f32 %v1845_v2, %v547_v17 }
 0x147   : > { %v880_v8 = vmax.f32 %v876_v9, 0.0  ;;  %v774_v9 = vsel %vm396_vm0, %v1856_v7, %v761_v16 }
 0x149   : > { %v505_v54 = vpop.permute.xlu1 %504  ;;  %v884_v6 = vmax.f32 %v1822_v19, %v880_v8  ;;  %v542_v19 = vmul.f32 %v1726_v57, %v1446_v30  ;;  %v805_v61 = vpop.permute.xlu2 %804  ;;  %v694_v30 = vmul.f32 %v1726_v57, %v1493_v50 }
 0x14a   : > { %v503_v12 = vpop.permute.xlu0 %502 }
 0x14b   : > { %v515_v26 = vsel %vm396_vm0, %v503_v12, %v505_v54  ;;  %928 = vmatmul.f32.vlgmr.msra.gmra.mxu2 %v884_v6  ;;  %v546_v59 = vadd.f32 %v542_v19, %v538_v11  ;;  %v738_v8 = vadd.f32 %v1827_v21, %v694_v30 }
 0x14c   : > { %v523_v20 = vadd.f32 %v515_v26, %v479_v28 }
 0x14d   : > { %v590_v56 = vadd.f32 %v1769_v10, %v546_v59  ;;  %v782_v14 = vadd.f32 %v774_v9, %v738_v8 }
 0x14e   : > { %v527_v3 = vadd.f32 %v523_v20, %v1679_v38 }
 0x14f   : > { %v634_v18 = vadd.f32 %v626_v23, %v590_v56 }
 0x150   : > { %v531_v40 = vmax.f32 %v527_v3, 0.0 }
 0x151   : > { %v763_v32 = vpop.permute.xlu1 %762  ;;  %v807_v51 = vpop.permute.xlu2 %806 }
 0x152   : > { %v617_v25 = vpop.permute.xlu0 %616  ;;  %v535_v45 = vmax.f32 %v415_v36, %v531_v40  ;;  %v775_v21 = vsel %vm396_vm0, %v763_v32, %v1890_v13 }
 0x153   : > { %v627_v10 = vsel %vm396_vm0, %v615_v5, %v617_v25 }
 0x154   : > { %v635_v37 = vadd.f32 %v627_v10, %v591_v39 }
 0x159   : > { %v861_v46 = vpop.permute.xlu1 %860  ;;  %v849_v54 = vpop.permute.xlu2 %848 }
 0x15a   : > { %v859_v52 = vpop.permute.xlu0 %858 }
 0x15b   : > { %v865_v47 = vsel %vm396_vm0, %v859_v52, %v861_v46 }
 0x15c   : > { %v873_v33 = vadd.f32 %v865_v47, %v829_v43 }
 0x15e   : > { %v877_v4 = vadd.f32 %v873_v33, %v1679_v38 }
 0x160   : > { %v881_v49 = vmax.f32 %v877_v4, 0.0 }
 0x161   : > { %v803_v24 = vpop.permute.xlu1 %802 }
 0x162   : > { %v657_v1 = vpop.permute.xlu0 %656  ;;  %v885_v62 = vmax.f32 %v693_v60, %v881_v49  ;;  %v818_v5 = vsel %vm396_vm0, %v803_v24, %v805_v61 }
 0x163   : > { %v670_v53 = vsel %vm396_vm0, %v655_v41, %v657_v1  ;;  %v826_v6 = vadd.f32 %v818_v5, %v782_v14 }
 0x164   : > { %v678_v42 = vadd.f32 %v670_v53, %v634_v18  ;;  %931 = vmatmul.f32.vlgmr.msra.gmra.mxu3 %v885_v62 }
 0x166   : > { %v682_v63 = vadd.f32 %v678_v42, %v1679_v38 }
 0x168   : > { %v686_v0 = vmax.f32 %v682_v63, 0.0 }
 0x169   : > { %v661_v48 = vpop.permute.xlu1 %660 }
 0x16a   : > { %v659_v22 = vpop.permute.xlu0 %658  ;;  %v690_v60 = vmax.f32 %v1839_v34, %v686_v0  ;;  %v695_v34 = vmul.f32 %v1751_v15, %v1493_v50 }
 0x16b   : > { %v671_v35 = vsel %vm396_vm0, %v659_v22, %v661_v48 }
 0x16c   : > { %v679_v27 = vadd.f32 %v671_v35, %v635_v37  ;;  %v739_v20 = vadd.f32 %v1860_v29, %v695_v34  ;;  %v1174_v29 = vld [vmem:[%s1960_s4] ss:$0 sm:$0xff] }
 0x16e   : > { %v683_v2 = vadd.f32 %v679_v27, %v1679_v38  ;;  %v783_v40 = vadd.f32 %v775_v21, %v739_v20 }
 0x170   : > { %v687_v57 = vmax.f32 %v683_v2, 0.0 }
 0x171   : > { %v847_v28 = vpop.permute.xlu1 %846 }
 0x172   : > { %v809_v12 = vpop.permute.xlu0 %808  ;;  %v862_v26 = vsel %vm396_vm0, %v847_v28, %v849_v54  ;;  %v691_v31 = vmax.f32 %v535_v45, %v687_v57 }
 0x173   : > { %v870_v7 = vadd.f32 %v862_v26, %v826_v6  ;;  %v819_v3 = vsel %vm396_vm0, %v807_v51, %v809_v12 }
 0x174   : > { %v827_v50 = vadd.f32 %v819_v3, %v783_v40 }
 0x175   : > { %v874_v16 = vadd.f32 %v870_v7, %v1679_v38 }
 0x177   : > { %v878_v36 = vmax.f32 %v874_v16, 0.0 }
 0x179   : > { %v853_v41 = vpop.permute.xlu1 %852  ;;  %v882_v25 = vmax.f32 %v690_v60, %v878_v36 }
 0x17a   : > { %v851_v15 = vpop.permute.xlu0 %850 }
 0x17b   : > { %v863_v44 = vsel %vm396_vm0, %v851_v15, %v853_v41  ;;  %922 = vmatmul.f32.vlgmr.msra.gmra.mxu0 %v882_v25 }
 0x17c   : > { %v871_v45 = vadd.f32 %v863_v44, %v827_v50 }
 0x17e   : > { %v875_v11 = vadd.f32 %v871_v45, %v1679_v38 }
 0x180   : > { %v879_v13 = vmax.f32 %v875_v11, 0.0 }
 0x182   : > { %v883_v32 = vmax.f32 %v691_v31, %v879_v13 }
 0x184   : > { %925 = vmatmul.f32.vlgmr.msra.gmra.mxu1 %v883_v32 }
 0x1ce   : > { %v929_v38 = vpop.f32.mrf.mxu2 }
 0x1cf   : > { %v930_v61 = vadd.f32 %v1174_v29, %v929_v38 }
 0x1d1   : > { %938 = vst.msk [vmem:[%s288_s18 + $0x10] sm:$0xff] %vm935_vm1, %v930_v61 }
 0x1e7   : > { %v932_v43 = vpop.f32.mrf.mxu3 }
 0x1e8   : > { %v933_v59 = vadd.f32 %v1174_v29, %v932_v43 }
 0x1ea   : > { %939 = vst.msk [vmem:[%s288_s18 + $0x18] sm:$0xff] %vm935_vm1, %v933_v59 }
 0x1f8   : > { %v923_v19 = vpop.f32.mrf.mxu0 }
 0x1f9   : > { %v924_v46 = vadd.f32 %v1174_v29, %v923_v19 }
 0x1fb   : > { %936 = vst.msk [vmem:[%s288_s18] sm:$0xff] %vm935_vm1, %v924_v46 }
 0x201   : > { %v926_v52 = vpop.f32.mrf.mxu1 }
 0x202   : > { %v927_v47 = vadd.f32 %v1174_v29, %v926_v52 }
 0x204   : > { %937 = vst.msk [vmem:[%s288_s18 + $0x8] sm:$0xff] %vm935_vm1, %v927_v47 }
 0x205 PF: > { %p17_p0 = scmp.ge.s32.totalorder %s1291_s24, 4   ;;  %s1966_s20 = smov %s1220_s21 }
 0x206   : > { %s1967_s21 = smov %s1224_s22  ;;  %s1968_s22 = smov %s1301_s27 }
 0x207   : > { %s1969_s23 = smov %s1291_s24  ;;  %19 = sbr.rel (!%p17_p0) target bundleno = 6 (0x6), region = 93 }
 0x20c   :  { %962 = vsyncpa [#allocation4], 1 }
 0x20d   :  { %964 = vsyncpa [#allocation4 + $0x1], 1 }
 0x20e   :  { %965 = vsyncpa [#allocation5], 1 }
 0x20f   :  { %967 = vsyncpa [#allocation5 + $0x1], 1 }

</bundles_post_ra>
